<compile_context>
chip_gen: v5e
topology: v5e:2x2
jax: 0.10.0
libtpu: 0.0.40
codegen_flags: <defaults>
</compile_context>

<pallas_src>
import functools

import jax
import jax.numpy as jnp
from jax.experimental import pallas as pl
from jax.experimental.pallas import tpu as pltpu


# ----------------------------------------------------------------------------
# Kernels (pixels on lanes, channels on sublanes)
# ----------------------------------------------------------------------------
def _mixed_op_kernel_mm(x_ref, w_ref, b_ref, s_ref, o_ref):
    """Matmul-reduction path (any Cout).

    x_ref : (1, Cin, TP)      input pixel tile (channels x pixels)
    w_ref : (K*Cout, Cin)     all K 1x1-conv weights, fused along sublanes
    b_ref : (K*Cout, 1)       all K biases
    s_ref : (Cout, K*Cout)    weighted-sum reduction matrix (weights[k] * I)^T
    o_ref : (1, Cout, TP)     output tile
    """
    x = x_ref[0]                                                   # (Cin, TP)
    p = jnp.dot(w_ref[...], x, preferred_element_type=jnp.float32)  # (KC, TP)
    p = jnp.maximum(p + b_ref[...], 0.0)                 # bias + ReLU, all ops
    o_ref[0] = jnp.dot(s_ref[...], p,
                       preferred_element_type=jnp.float32).astype(o_ref.dtype)


def _mixed_op_kernel_vpu(x_ref, w_ref, b_ref, r_ref, o_ref, *, k_ops, cout):
    """VPU-reduction path (Cout % 8 == 0): no second matmul, no S operand.

    r_ref : (K*Cout, 1)  arch weight repeated per output channel
                         (r[k*Cout + j] = weights[k]).
    """
    x = x_ref[0]                                                   # (Cin, TP)
    p = jnp.dot(w_ref[...], x, preferred_element_type=jnp.float32)  # (KC, TP)
    p = jnp.maximum(p + b_ref[...], 0.0)
    p = p * r_ref[...]                          # scale each op's block (VPU)
    # Sublane-aligned split (Cout % 8 == 0) -> free relayout, then K adds.
    o_ref[0] = jnp.sum(p.reshape(k_ops, cout, p.shape[-1]),
                       axis=0).astype(o_ref.dtype)


# ----------------------------------------------------------------------------
# Wrapper
# ----------------------------------------------------------------------------
def _round_up(v, m):
    return (v + m - 1) // m * m


def _vmem_budget_bytes():
    """Per-chip vmem_limit_bytes: ~75% of physical VMEM, capped at 100 MiB."""
    phys = 64 * 1024 * 1024          # conservative default (v7x per-TC VMEM)
    try:
        phys = int(getattr(pltpu.get_tpu_info(), "vmem_capacity_bytes", phys))
    except Exception:
        pass
    return min(int(phys * 0.75), 100 * 1024 * 1024)


def _choose_pixel_tile(hw, cin, cout, kc, vmem_limit):
    """Pick TP (pixels per tile, multiple of 128) by bytes, and padded HW."""
    hw128 = _round_up(hw, 128)
    # fp32 bytes of pipelined state per pixel column:
    #   2x double-buffered x rows (Cin) + 2x double-buffered out rows (Cout)
    #   + the fp32 intermediate p (K*Cout rows).
    per_col = 4 * (2 * cin + 2 * cout + kc)
    # Constant operands, assumed double-buffered (conservative).
    const_bytes = 2 * 4 * (kc * cin + kc + cout * kc)
    budget = max(int(0.6 * vmem_limit) - const_bytes, 128 * per_col)
    tp = max(128, (budget // per_col) // 128 * 128)
    tp = min(tp, 16384, hw128)       # MiB-class tiles; no win beyond that
    n_tiles = pl.cdiv(hw128, tp)
    tp = _round_up(pl.cdiv(hw128, n_tiles), 128)   # rebalance so tiles divide
    return tp, n_tiles * tp


def mixed_op(x_nchw, weights, conv_w, conv_b):
    """Weighted sum of K candidate (1x1 conv + bias + ReLU) blocks.

    x_nchw : (N, Cin, H, W) float32
    weights: (K,)           float32 mixing weights (any sign)
    conv_w : (K, Cin, Cout) float32
    conv_b : (K, Cout)      float32
    returns: (N, Cout, H, W) float32
    """
    N, Cin, H, W = x_nchw.shape
    K, _, Cout = conv_w.shape
    KC = K * Cout
    HW = H * W

    # NCHW -> (N, Cin, H*W): metadata-only merge of the trailing spatial dims.
    x3 = x_nchw.astype(jnp.float32).reshape(N, Cin, HW)

    vmem_limit = _vmem_budget_bytes()
    TP, HW_pad = _choose_pixel_tile(HW, Cin, Cout, KC, vmem_limit)
    if HW_pad != HW:
        # Padded pixel columns produce ReLU(b)-derived garbage; they are
        # sliced off below — keep that slice if this ever gets aliased.
        x3 = jnp.pad(x3, ((0, 0), (0, 0), (0, HW_pad - HW)))

    # Fused candidate weights/biases in the transposed orientation.
    w_all_t = jnp.transpose(conv_w, (0, 2, 1)).reshape(KC, Cin).astype(jnp.float32)
    b_all = conv_b.reshape(KC, 1).astype(jnp.float32)

    grid = (N, HW_pad // TP)

    x_spec = pl.BlockSpec((1, Cin, TP), lambda n, t: (n, 0, t))
    o_spec = pl.BlockSpec((1, Cout, TP), lambda n, t: (n, 0, t))
    w_spec = pl.BlockSpec((KC, Cin), lambda n, t: (0, 0))
    b_spec = pl.BlockSpec((KC, 1), lambda n, t: (0, 0))

    use_vpu_reduce = (Cout % 8 == 0)
    if use_vpu_reduce:
        kernel = functools.partial(_mixed_op_kernel_vpu, k_ops=K, cout=Cout)
        r_col = jnp.repeat(weights.astype(jnp.float32), Cout).reshape(KC, 1)
        in_specs = [x_spec, w_spec, b_spec,
                    pl.BlockSpec((KC, 1), lambda n, t: (0, 0))]
        operands = (x3, w_all_t, b_all, r_col)
        flops = 2 * N * HW_pad * Cin * KC + 3 * N * HW_pad * KC
        const_bytes = (w_all_t.size + b_all.size + r_col.size) * 4
    else:
        kernel = _mixed_op_kernel_mm
        # S^T: (Cout, K*Cout) block matrix of weights[k] * I_Cout (exact for
        # any-sign weights; the reduction runs on the MXU).
        s_t = jnp.transpose(
            weights.astype(jnp.float32)[:, None, None]
            * jnp.eye(Cout, dtype=jnp.float32)[None, :, :],
            (1, 0, 2)).reshape(Cout, KC)
        in_specs = [x_spec, w_spec, b_spec,
                    pl.BlockSpec((Cout, KC), lambda n, t: (0, 0))]
        operands = (x3, w_all_t, b_all, s_t)
        flops = 2 * N * HW_pad * Cin * KC + 2 * N * HW_pad * KC * Cout
        const_bytes = (w_all_t.size + b_all.size + s_t.size) * 4

    bytes_accessed = (x3.size + N * HW_pad * Cout) * 4 + const_bytes

    out = pl.pallas_call(
        kernel,
        out_shape=jax.ShapeDtypeStruct((N, Cout, HW_pad), jnp.float32),
        grid_spec=pltpu.PrefetchScalarGridSpec(
            num_scalar_prefetch=0,
            grid=grid,
            in_specs=in_specs,
            out_specs=o_spec,
        ),
        compiler_params=pltpu.CompilerParams(
            dimension_semantics=("parallel", "parallel"),
            vmem_limit_bytes=vmem_limit,
        ),
        cost_estimate=pl.CostEstimate(
            flops=int(flops), transcendentals=0,
            bytes_accessed=int(bytes_accessed)),
    )(*operands)

    if HW_pad != HW:
        out = out[:, :, :HW]
    # (N, Cout, H*W) -> NCHW: metadata-only split of the pixel axis.
    return out.reshape(N, Cout, H, W)


# ----------------------------------------------------------------------------
# Pure-JAX reference (matches the PyTorch MixedOp semantics exactly)
# ----------------------------------------------------------------------------
def _reference(x_nchw, weights, conv_w, conv_b):
    N, Cin, H, W = x_nchw.shape
    K, _, Cout = conv_w.shape
    x_flat = jnp.transpose(x_nchw, (0, 2, 3, 1)).reshape(-1, Cin)
    out = jnp.zeros((x_flat.shape[0], Cout), jnp.float32)
    for k in range(K):
        y = jnp.maximum(x_flat @ conv_w[k] + conv_b[k], 0.0)
        out = out + weights[k] * y
    return out.reshape(N, H, W, Cout).transpose(0, 3, 1, 2)


if __name__ == "__main__":
    key = jax.random.PRNGKey(0)
    k_x, k_w, k_cw, k_cb = jax.random.split(key, 4)

    # Primary test: Cout = 4 (not sublane-aligned) -> matmul-reduction path.
    N, Cin, Cout, H, W = 2, 4, 4, 16, 16
    K = 3  # number of candidate blocks in the mixed op

    x = jax.random.normal(k_x, (N, Cin, H, W), dtype=jnp.float32)
    arch_w = jax.nn.softmax(jax.random.normal(k_w, (K,), dtype=jnp.float32))
    conv_w = 0.1 * jax.random.normal(k_cw, (K, Cin, Cout), dtype=jnp.float32)
    conv_b = 0.1 * jax.random.normal(k_cb, (K, Cout), dtype=jnp.float32)

    out = jax.block_until_ready(mixed_op(x, arch_w, conv_w, conv_b))
    ref = _reference(x, arch_w, conv_w, conv_b)
    assert out.shape == (N, Cout, H, W)
    assert jnp.allclose(out, ref, atol=1e-4, rtol=1e-4), \
        float(jnp.max(jnp.abs(out - ref)))

    # Secondary test: Cout = 8 (sublane-aligned) -> VPU weighted-reduction path.
    Cout2 = 8
    conv_w2 = 0.1 * jax.random.normal(k_cw, (K, Cin, Cout2), dtype=jnp.float32)
    conv_b2 = 0.1 * jax.random.normal(k_cb, (K, Cout2), dtype=jnp.float32)
    out2 = jax.block_until_ready(mixed_op(x, arch_w, conv_w2, conv_b2))
    ref2 = _reference(x, arch_w, conv_w2, conv_b2)
    assert out2.shape == (N, Cout2, H, W)
    assert jnp.allclose(out2, ref2, atol=1e-4, rtol=1e-4), \
        float(jnp.max(jnp.abs(out2 - ref2)))

    print("KERNEL_OK")
</pallas_src>

<mosaic_0001>
module attributes {stable_mosaic.version = 11 : i64} {
  func.func @_mixed_op_kernel_mm(%arg0: i32, %arg1: i32, %arg2: memref<1x4x256xf32, #tpu.memory_space<vmem>>, %arg3: memref<12x4xf32, #tpu.memory_space<vmem>>, %arg4: memref<12x1xf32, #tpu.memory_space<vmem>>, %arg5: memref<4x12xf32, #tpu.memory_space<vmem>>, %arg6: memref<1x4x256xf32, #tpu.memory_space<vmem>>) attributes {dimension_semantics = [#tpu.dimension_semantics<parallel>, #tpu.dimension_semantics<parallel>], iteration_bounds = array<i64: 2, 1>, scalar_prefetch = 0 : i64, scratch_operands = 0 : i64, tpu.core_type = #tpu.core_type<tc>, window_params = [{transform_indices = @transform_0, window_bounds = array<i64: 1, 4, 256>}, {pipeline_mode = #tpu.pipeline_mode<synchronous>, transform_indices = @transform_1, window_bounds = array<i64: 12, 4>}, {pipeline_mode = #tpu.pipeline_mode<synchronous>, transform_indices = @transform_2, window_bounds = array<i64: 12, 1>}, {pipeline_mode = #tpu.pipeline_mode<synchronous>, transform_indices = @transform_3, window_bounds = array<i64: 4, 12>}, {transform_indices = @transform_4, window_bounds = array<i64: 1, 4, 256>}]} {
    %c0 = arith.constant 0 : index
    %c0_0 = arith.constant 0 : index
    %c0_1 = arith.constant 0 : index
    %0 = vector.load %arg2[%c0, %c0_0, %c0_1] : memref<1x4x256xf32, #tpu.memory_space<vmem>>, vector<1x4x256xf32>
    %1 = vector.shape_cast %0 : vector<1x4x256xf32> to vector<4x256xf32>
    %c0_2 = arith.constant 0 : index
    %c0_3 = arith.constant 0 : index
    %2 = vector.load %arg3[%c0_2, %c0_3] : memref<12x4xf32, #tpu.memory_space<vmem>>, vector<12x4xf32>
    %cst = arith.constant dense<0.000000e+00> : vector<12x256xf32>
    %3 = tpu.matmul %2, %1, %cst {dimension_numbers = #tpu.dot_dimension_numbers<[1], [0], [0], [1], [0, 0, 1, 1], [], []>} : vector<12x4xf32>, vector<4x256xf32>, vector<12x256xf32> -> vector<12x256xf32>
    %c0_4 = arith.constant 0 : index
    %c0_5 = arith.constant 0 : index
    %4 = vector.load %arg4[%c0_4, %c0_5] : memref<12x1xf32, #tpu.memory_space<vmem>>, vector<12x1xf32>
    %5 = vector.broadcast %4 : vector<12x1xf32> to vector<12x256xf32>
    %6 = arith.addf %3, %5 : vector<12x256xf32>
    %cst_6 = arith.constant 0.000000e+00 : f32
    %7 = vector.broadcast %cst_6 : f32 to vector<12x256xf32>
    %8 = arith.maximumf %6, %7 : vector<12x256xf32>
    %c0_7 = arith.constant 0 : index
    %c0_8 = arith.constant 0 : index
    %9 = vector.load %arg5[%c0_7, %c0_8] : memref<4x12xf32, #tpu.memory_space<vmem>>, vector<4x12xf32>
    %cst_9 = arith.constant dense<0.000000e+00> : vector<4x256xf32>
    %10 = tpu.matmul %9, %8, %cst_9 {dimension_numbers = #tpu.dot_dimension_numbers<[1], [0], [0], [1], [0, 0, 1, 1], [], []>} : vector<4x12xf32>, vector<12x256xf32>, vector<4x256xf32> -> vector<4x256xf32>
    %c0_10 = arith.constant 0 : index
    %c0_11 = arith.constant 0 : index
    %c0_12 = arith.constant 0 : index
    %11 = vector.load %arg6[%c0_10, %c0_11, %c0_12] : memref<1x4x256xf32, #tpu.memory_space<vmem>>, vector<1x4x256xf32>
    %12 = vector.shape_cast %11 : vector<1x4x256xf32> to vector<4x256xf32>
    %13 = vector.shape_cast %10 : vector<4x256xf32> to vector<1x4x256xf32>
    tpu.vector_store %arg6[%c0_10, %c0_11, %c0_12], %13 {strides = array<i32>} : memref<1x4x256xf32, #tpu.memory_space<vmem>>, vector<1x4x256xf32>,
    return
  }
  func.func @transform_0(%arg0: i32, %arg1: i32) -> (i32, i32, i32) {
    %c0_i32 = arith.constant 0 : i32
    %c0_i32_0 = arith.constant 0 : i32
    return %arg0, %c0_i32, %arg1 : i32, i32, i32
  }
  func.func @transform_1(%arg0: i32, %arg1: i32) -> (i32, i32) {
    %c0_i32 = arith.constant 0 : i32
    %c0_i32_0 = arith.constant 0 : i32
    %c0_i32_1 = arith.constant 0 : i32
    return %c0_i32, %c0_i32_0 : i32, i32
  }
  func.func @transform_2(%arg0: i32, %arg1: i32) -> (i32, i32) {
    %c0_i32 = arith.constant 0 : i32
    %c0_i32_0 = arith.constant 0 : i32
    %c0_i32_1 = arith.constant 0 : i32
    return %c0_i32, %c0_i32_0 : i32, i32
  }
  func.func @transform_3(%arg0: i32, %arg1: i32) -> (i32, i32) {
    %c0_i32 = arith.constant 0 : i32
    %c0_i32_0 = arith.constant 0 : i32
    %c0_i32_1 = arith.constant 0 : i32
    return %c0_i32, %c0_i32_0 : i32, i32
  }
  func.func @transform_4(%arg0: i32, %arg1: i32) -> (i32, i32, i32) {
    %c0_i32 = arith.constant 0 : i32
    %c0_i32_0 = arith.constant 0 : i32
    return %arg0, %c0_i32, %arg1 : i32, i32, i32
  }
}

</mosaic_0001>

<bundles_post_ra>
// kernel: tpu_custom_call.1
= control target key start
LH: loop header
LB: loop body
LE: loop exit
PB: predicated region body
PF: predicated region fallthrough
CT: control target
= control target key end

     0   :  { %9 = vsyncpa [#allocation3], 0  ;;  %s765_s0 = inlined_call_operand.vmem [shape: f32[2,4,256], index: 0, kind: input, shape index: {}]   ;;  %s766_s1 = inlined_call_operand.vmem [shape: f32[12,4], index: 1, kind: input, shape index: {}]   ;;  %s767_s2 = inlined_call_operand.vmem [shape: f32[12,1], index: 2, kind: input, shape index: {}]   ;;  %s768_s3 = inlined_call_operand.vmem [shape: f32[4,12], index: 3, kind: input, shape index: {}]   ;;  %s769_s4 = inlined_call_operand.hbm [shape: f32[2,4,256], index: 4, kind: output, shape index: {}]  }
   0x1   :  { %11 = vsyncpa [#allocation3 + $0x1], 0  ;;  %s648_s15 = smov 0   ;;  %s650_s16 = smov 0  }
   0x2   :  { %s652_s17 = smov 0   ;;  %s654_s18 = smov 0  }
   0x3   :  { %s656_s19 = smov 0   ;;  %s658_s20 = smov 0  }
   0x4 LB: > { %s460_s21 = sadd.s32 4294967295, %s620_s20   ;;  %s461_s22 = sadd.s32 4294967294, %s620_s20   ;;  %s620_s20 = sphi %s658_s20, %s17_s20   ;;  %s616_s19 = sphi %s656_s19, %s776_s19   ;;  %s612_s18 = sphi %s654_s18, %s775_s18   ;;  %s608_s17 = sphi %s652_s17, %s774_s17   ;;  %s604_s16 = sphi %s650_s16, %s773_s16   ;;  %s600_s15 = sphi %s648_s15, %s772_s15  }
   0x5   : > { %s29_s23 = sadd.s32 1, %s616_s19  ;;  %s129_s24 = sadd.s32 1, %s608_s17 }
   0x6   : > { %p31_p0 = scmp.ge.s32.totalorder %s29_s23, 2  ;;  %p139_p1 = scmp.ne.s32.totalorder %s608_s17, %s604_s16 }
   0x7   : > { %p140_p2 = scmp.eq.s32.totalorder %s460_s21, 1  ;;  %p145_p3 = scmp.ne.s32.totalorder %s604_s16, %s600_s15 }
   0x8   : > { %s778_s23 = smov (%p31_p0, %s29_s23), 0  ;;  %p146_p5 = scmp.eq.s32.totalorder %s461_s22, 1 }
   0x9   : > { %p688_p4 = por %p140_p2, %p139_p1  ;;  %s124_s26 = ssub.s32 %s616_s19, %s778_s23 }
   0xa   : > { %p464_p6 = scmp.ge.s32.totalorder %s620_s20, 1  ;;  %p127_p7 = scmp.eq.s32.totalorder %s124_s26, 0 }
   0xb   : > { %p695_p8 = por %p146_p5, %p145_p3  ;;  %p186_p9 = scmp.lt.s32.totalorder %s620_s20, 3 }
   0xc   : > { %s701_s28 = scalar_select %p127_p7, %s608_s17, %s129_s24  }
   0xd   : > { %p187_p10 = pnand %p464_p6, %p186_p9 }
   0xe   : > { %p217_p11 = scmp.lt.s32.totalorder (!%p187_p10), %s612_s18, 1  ;;  %s213_s26 = sand.u32 (!%p187_p10), 1, %s604_s16  }
   0xf   : > { %190 = sbr.rel (%p187_p10) target bundleno = 313 (0x139), region = 36  ;;  %s465_s29 = sshll.u32 (!%p187_p10), %s213_s26, 3 }
  0x10   : > { %s484_s30 = sshll.u32 (!%p187_p10), %s612_s18, 3  ;;  %s215_s8 = scalar_lea.vmem (!%p187_p10), [#allocation2], %s465_s29 }
  0x11   : > { %s379_s7 = scalar_lea.hbm (!%p187_p10), %s769_s4, %s484_s30  ;;  %s366_s11 = scalar_lea.sflag (!%p187_p10), [#allocation3], %s213_s26 }
  0x12   : > { %s383_s10 = sshll.u32 (!%p187_p10), %s379_s7, 4  ;;  %s562_s21 = scalar_lea.hbm (!%p187_p10), %s769_s4, 16  ;;  %s384_s10 = int_to_ptr.hbm [resolvable:$true] %s383_s10 }
  0x13   : > { %s556_s12 = sshra.s32 (!%p187_p10), %s384_s10, 4  ;;  %s557_s12 = int_to_ptr.hbm [resolvable:$true] %s556_s12 }
  0x14   : > { %v622_v0 = vmov 0   ;;  %v231_v1 = vld [vmem:[%s767_s2 + $0x8] sm:$0xf]  ;;  %s218_s5 = scalar_select %p217_p11, %s612_s18, 1  ;;  %v230_v3 = vld [vmem:[%s767_s2] sm:$0xff]  ;;  %vm253_vm0 = vcmask 1043456  }
  0x15   : > { %541 = vset.pattern.permute.xlu0 %v622_v0  ;;  %v228_v4 = vld [vmem:[%s766_s1] sm:$0xff]  ;;  %vm246_vm1 = vcmask 31744   ;;  %v229_v7 = vld [vmem:[%s766_s1 + $0x8] sm:$0xf]  ;;  %vm309_vm2 = vcmask 97280   ;;  %s558_s18 = scalar_lea.hbm %s557_s12, 8  ;;  %p563_p1 = scmp.lt.s32.totalorder %s557_s12, %s769_s4 }
  0x16   : > { %239 = vperm.xlu0 %541, %v231_v1   ;;  %s483_s6 = sshll.u32 %s218_s5, 3  ;;  %v308_v22 = vld [vmem:[%s768_s3] sm:$0xf]  ;;  %p559_p12 = scmp.ne.s32.totalorder %s557_s12, %s558_s18 }
  0x17   : > { %s224_s9 = scalar_lea.vmem %s765_s0, %s483_s6  ;;  %p564_p2 = scmp.lt.s32.totalorder %s562_s21, %s558_s18 }
  0x18   : > { %v227_v2 = vld [vmem:[%s224_s9] sm:$0xff]  ;;  %s381_s9 = sshll.u32 %s215_s8, 4  ;;  %p560_p13 = pnand %p559_p12, %p688_p4  ;;  %s382_s9 = int_to_ptr.vmem [resolvable:$true] %s381_s9 }
  0x19   : > { %243 = vst [vmem:[#allocation1] ss:$2 sm:$0xff] %v227_v2  ;;  %p565_p3 = por %p564_p2, %p563_p1 }
  0x1a   : > { %p561_p0 = pneg %p560_p13 }
  0x1c   : > { %p566_p5 = pnand %p565_p3, %p561_p0 }
  0x1e   : > { %234 = vperm.xlu0 %541, %v230_v3  }
  0x20   : > { %v244_v5 = vld.sshfl [vmem:[#allocation1] sm:$0xff pattern:$0x75316420]  ;;  %v245_v6 = vld.sshfl [vmem:[#allocation1 + $0x8] sm:$0xff pattern:$0x75316420] }
  0x21   : > { %468 = vmatpush.msk.msra.mxu0 %vm253_vm0, %v244_v5  ;;  %471 = vmatpush.msk.msra.mxu1 %vm253_vm0, %v245_v6 }
  0x22   : > { %469 = vmatmul.msk.f32.vlgmr.msra.gmra.mxu0 %vm246_vm1, %v228_v4  ;;  %472 = vmatmul.msk.f32.vlgmr.msra.gmra.mxu1 %vm246_vm1, %v228_v4 }
  0x2a   : > { %470 = vmatmul.msk.f32.gmra.mxu0 %vm246_vm1, %v229_v7  ;;  %473 = vmatmul.msk.f32.gmra.mxu1 %vm246_vm1, %v229_v7 }
  0x88   : > { %v240_v8 = vpop.permute.xlu0 %239 }
  0x90   : > { %v235_v11 = vpop.permute.xlu0 %234 }
  0x9f   : > { %v275_v9 = vpop.f32.mrf.mxu0  ;;  %v298_v10 = vpop.f32.mrf.mxu1 }
  0xa0   : > { %v276_v14 = vadd.f32 %v275_v9, %v235_v11  ;;  %v299_v15 = vadd.f32 %v298_v10, %v235_v11 }
  0xa2   : > { %v304_v20 = vmax.f32 %v276_v14, 0.0  ;;  %v305_v21 = vmax.f32 %v299_v15, 0.0 }
  0xa7   : > { %v278_v12 = vpop.f32.mrf.mxu0  ;;  %v301_v13 = vpop.f32.mrf.mxu1 }
  0xa8   : > { %v279_v16 = vadd.f32 %v278_v12, %v240_v8  ;;  %v302_v17 = vadd.f32 %v301_v13, %v240_v8 }
  0xaa   : > { %v306_v18 = vmax.f32 %v279_v16, 0.0  ;;  %v307_v19 = vmax.f32 %v302_v17, 0.0 }
  0xac   : > { %474 = vmatpush.msk.msra.mxu2 %vm253_vm0, %v306_v18  ;;  %476 = vmatpush.msk.msra.mxu3 %vm253_vm0, %v307_v19 }
  0xae   : > { %334 = vmatpush.msra.mxu2 %v304_v20  ;;  %354 = vmatpush.msra.mxu3 %v305_v21 }
  0xaf   : > { %477 = vmatmul.msk.f32.vlgmr.msra.gmra.mxu3 %vm309_vm2, %v308_v22  ;;  %475 = vmatmul.msk.f32.vlgmr.msra.gmra.mxu2 %vm309_vm2, %v308_v22 }
 0x132   : > { %v356_v23 = vpop.f32.mrf.mxu3  ;;  %v336_v24 = vpop.f32.mrf.mxu2 }
 0x133   : > { %v361_v25 = vrot.slane %v356_v23, 4 }
 0x135   : > { %v362_v26 = vsel %vm253_vm0, %v336_v24, %v361_v25 }
 0x136   : > { %364 = vst [vmem:[%s215_s8] sm:$0xff] %v362_v26 }
 0x137   : > { %569 = shalt.err (!%p566_p5)
}
 0x138   : > { %485 = dma.vmem_to_hbm [thread:$0]  (%p688_p4), %s382_s9, 128, %s384_s10, %s366_s11  }
 0x139 PF: > { %p491_p6 = scmp.ge.s32.totalorder %s620_s20, 2  ;;  %s395_s26 = sand.u32 1, %s600_s15  }
 0x13a   : > { %s396_s29 = scalar_lea.sflag [#allocation3], %s395_s26 }
 0x13b   : > { %p488_p7 = pnand %p491_p6, %p695_p8 }
 0x13d   : > { %p489_p9 = pneg %p488_p7 }
 0x13f   : > { %595 = dma.done.wait (%p489_p9), %s396_s29, 128  }
 0x140   : > { %597 = vsyncadd (%p489_p9), %s396_s29, 4294967168  ;;  %s17_s20 = sadd.s32 1, %s620_s20   ;;  %s772_s15 = smov %s604_s16 }
 0x141   : > { %p14_p10 = scmp.ge.s32.totalorder %s17_s20, 4   ;;  %s773_s16 = smov %s608_s17 }
 0x142   : > { %s774_s17 = smov %s701_s28  ;;  %s775_s18 = smov %s616_s19 }
 0x143   : > { %s776_s19 = smov %s778_s23  ;;  %16 = sbr.rel (!%p14_p10) target bundleno = 4 (0x4), region = 71 }
 0x148   :  { %402 = vsyncpa [#allocation3], 1 }
 0x149   :  { %404 = vsyncpa [#allocation3 + $0x1], 1 }

</bundles_post_ra>
